<compile_context>
chip_gen: v5e
topology: v5e:2x2
jax: 0.10.0
libtpu: 0.0.40
codegen_flags: <defaults>
</compile_context>

<pallas_src>
import jax
import jax.numpy as jnp
from jax.experimental import pallas as pl
from jax.experimental.pallas import tpu as pltpu

HIDDEN1 = 120
HIDDEN2 = 100
LANE = 128


def _round_up(n, m):
    return ((n + m - 1) // m) * m


def _cdiv(a, b):
    return (a + b - 1) // b


# ----------------------------------------------------------------------------
# Kernel: one batch tile per grid step; BN already folded into w/b; matmul
# feature dims padded to 128 lanes; output stored at the true d_out width.
# ----------------------------------------------------------------------------
def power_system_kernel(x_ref, w1_ref, b1_ref, w2_ref, b2_ref, w3_ref, b3_ref,
                        o_ref):
    cd = w1_ref.dtype                     # MXU operand dtype (bf16 or f32)
    bf16_act = (cd == jnp.bfloat16)
    d_out = o_ref.shape[-1]               # true (unpadded) output width

    x = x_ref[...].astype(cd)

    # ---- fc1 (+ folded bn1) + tanh -----------------------------------------
    z1 = jnp.dot(x, w1_ref[...], preferred_element_type=jnp.float32)
    a1 = z1 + b1_ref[...]                                  # f32 bias add
    h1 = jnp.tanh(a1.astype(cd)) if bf16_act else jnp.tanh(a1)

    # ---- dropout(0.2): eval-mode identity ----------------------------------

    # ---- fc2 (+ folded bn2) + tanh -----------------------------------------
    z2 = jnp.dot(h1.astype(cd), w2_ref[...], preferred_element_type=jnp.float32)
    a2 = z2 + b2_ref[...]
    h2 = jnp.tanh(a2.astype(cd)) if bf16_act else jnp.tanh(a2)

    # ---- fc3 ----------------------------------------------------------------
    z3 = jnp.dot(h2.astype(cd), w3_ref[...], preferred_element_type=jnp.float32)
    # Store only the real output columns (masked vst; padded output traffic
    # eliminated from the HBM writeback).
    o_ref[...] = (z3 + b3_ref[...])[:, :d_out].astype(o_ref.dtype)


# ----------------------------------------------------------------------------
# Host-side wrapper
# ----------------------------------------------------------------------------
def power_system_nn(x, params, *, block_batch=2048,
                    vmem_limit_bytes=48 * 1024 * 1024):
    """Fused PowerSystemNN forward pass (inference) with a single pallas_call."""
    B, d_in = x.shape
    d_out = params["output_dim"]

    w1, b1 = params["w1"], params["b1"]
    w2, b2 = params["w2"], params["b2"]
    w3, b3 = params["w3"], params["b3"]

    # Batch tiling that minimizes dead rows: split B into n_steps near-equal
    # tiles, each rounded up to the f32 sublane count (8).  Small batches get
    # TB == round_up(B, 8) and usually no padding copy at all.
    n_steps = max(1, _cdiv(B, block_batch))
    TB = _round_up(_cdiv(B, n_steps), 8)
    B_pad = n_steps * TB
    if B_pad != B:
        x = jnp.pad(x, ((0, B_pad - B), (0, 0)))

    grid = (n_steps,)

    def batch_map(i):
        return (i, 0)

    def fixed_map(i):   # weights/biases: same block every step -> VMEM resident
        return (0, 0)

    in_specs = [
        pl.BlockSpec((TB, d_in), batch_map),
        pl.BlockSpec(w1.shape, fixed_map),
        pl.BlockSpec(b1.shape, fixed_map),
        pl.BlockSpec(w2.shape, fixed_map),
        pl.BlockSpec(b2.shape, fixed_map),
        pl.BlockSpec(w3.shape, fixed_map),
        pl.BlockSpec(b3.shape, fixed_map),
    ]
    out_spec = pl.BlockSpec((TB, d_out), batch_map)

    out = pl.pallas_call(
        power_system_kernel,
        out_shape=jax.ShapeDtypeStruct((B_pad, d_out), jnp.float32),
        grid=grid,
        in_specs=in_specs,
        out_specs=out_spec,
        compiler_params=pltpu.CompilerParams(
            dimension_semantics=("parallel",),
            vmem_limit_bytes=vmem_limit_bytes,
        ),
    )(x, w1, b1, w2, b2, w3, b3)

    return out if B_pad == B else out[:B]   # contiguous prefix, cheap


# ----------------------------------------------------------------------------
# Parameter construction: raw PyTorch-equivalent params, then BN-fold + pad.
# ----------------------------------------------------------------------------
def init_raw_params(key, input_dim, output_dim, dtype=jnp.float32):
    """PyTorch-style Linear init plus (non-trivial) BatchNorm1d running stats."""
    def linear(k, fan_in, fan_out):
        kw, kb = jax.random.split(k)
        bound = 1.0 / (fan_in ** 0.5)
        w = jax.random.uniform(kw, (fan_in, fan_out), dtype, -bound, bound)
        b = jax.random.uniform(kb, (fan_out,), dtype, -bound, bound)
        return w, b

    def batchnorm(k, n):
        kg, kb, km, kv = jax.random.split(k, 4)
        return dict(
            gamma=jax.random.uniform(kg, (n,), dtype, 0.5, 1.5),
            beta=0.1 * jax.random.normal(kb, (n,), dtype),
            mean=0.1 * jax.random.normal(km, (n,), dtype),
            var=jax.random.uniform(kv, (n,), dtype, 0.5, 1.5),
            eps=1e-5,
        )

    k1, k2, k3, kb1, kb2 = jax.random.split(key, 5)
    w1, b1 = linear(k1, input_dim, HIDDEN1)
    w2, b2 = linear(k2, HIDDEN1, HIDDEN2)
    w3, b3 = linear(k3, HIDDEN2, output_dim)
    return dict(w1=w1, b1=b1, bn1=batchnorm(kb1, HIDDEN1),
                w2=w2, b2=b2, bn2=batchnorm(kb2, HIDDEN2),
                w3=w3, b3=b3)


def prepare_params(raw, compute_dtype=jnp.bfloat16):
    """Fold inference-mode BatchNorm into the preceding Linear, zero-pad the
    matmul feature dims to the 128-lane width, and cast MXU operands to
    `compute_dtype` (bf16 default; biases stay f32)."""
    def fold(w, b, bn):
        scale = bn["gamma"] / jnp.sqrt(bn["var"] + bn["eps"])
        shift = bn["beta"] - bn["mean"] * scale
        return w * scale[None, :], b * scale + shift

    w1, b1 = fold(raw["w1"], raw["b1"], raw["bn1"])
    w2, b2 = fold(raw["w2"], raw["b2"], raw["bn2"])
    w3, b3 = raw["w3"], raw["b3"]
    d_out = w3.shape[1]

    h1p = _round_up(HIDDEN1, LANE)   # 128
    h2p = _round_up(HIDDEN2, LANE)   # 128
    d_outp = _round_up(d_out, LANE)  # 128 (kernel-internal only)

    def pad2(w, rows, cols):
        return jnp.pad(w, ((0, rows - w.shape[0]), (0, cols - w.shape[1])))

    def pad_vec(b, n):
        return jnp.pad(b, (0, n - b.shape[0])).reshape(1, n)

    return dict(
        w1=pad2(w1, w1.shape[0], h1p).astype(compute_dtype),
        b1=pad_vec(b1, h1p).astype(jnp.float32),
        w2=pad2(w2, h1p, h2p).astype(compute_dtype),
        b2=pad_vec(b2, h2p).astype(jnp.float32),
        w3=pad2(w3, h2p, d_outp).astype(compute_dtype),
        b3=pad_vec(b3, d_outp).astype(jnp.float32),
        output_dim=d_out,
        compute_dtype=compute_dtype,
    )


# ----------------------------------------------------------------------------
# Pure-JAX reference (unfolded BN, un-padded, f32) for correctness checking.
# ----------------------------------------------------------------------------
def reference_forward(x, raw):
    def bn_apply(z, bn):
        scale = bn["gamma"] / jnp.sqrt(bn["var"] + bn["eps"])
        return (z - bn["mean"]) * scale + bn["beta"]

    h = jnp.tanh(bn_apply(x @ raw["w1"] + raw["b1"], raw["bn1"]))
    h = jnp.tanh(bn_apply(h @ raw["w2"] + raw["b2"], raw["bn2"]))
    return h @ raw["w3"] + raw["b3"]


if __name__ == "__main__":
    key = jax.random.PRNGKey(0)
    k_param, k_x = jax.random.split(key)

    batch, input_dim, output_dim = 8, 32, 10
    raw = init_raw_params(k_param, input_dim, output_dim)
    x = jax.random.normal(k_x, (batch, input_dim), jnp.float32)
    ref = reference_forward(x, raw)

    # f32 compute path: tight correctness check.
    params_f32 = prepare_params(raw, compute_dtype=jnp.float32)
    out_f32 = jax.block_until_ready(power_system_nn(x, params_f32))
    assert out_f32.shape == (batch, output_dim)
    assert jnp.allclose(out_f32, ref, atol=1e-4, rtol=1e-4), (
        float(jnp.max(jnp.abs(out_f32 - ref))))

    # bf16 MXU-operand path (default, recommended for v5e/v6e/v7x): looser check.
    params_bf16 = prepare_params(raw)  # compute_dtype=bf16 default
    out_bf16 = jax.block_until_ready(power_system_nn(x, params_bf16))
    assert out_bf16.shape == (batch, output_dim)
    assert jnp.allclose(out_bf16, ref, atol=5e-2, rtol=5e-2), (
        float(jnp.max(jnp.abs(out_bf16 - ref))))

    print("KERNEL_OK")
</pallas_src>

<mosaic_0001>
module attributes {stable_mosaic.version = 11 : i64} {
  func.func @power_system_kernel(%arg0: i32, %arg1: memref<8x32xf32, #tpu.memory_space<vmem>>, %arg2: memref<32x128xf32, #tpu.memory_space<vmem>>, %arg3: memref<1x128xf32, #tpu.memory_space<vmem>>, %arg4: memref<128x128xf32, #tpu.memory_space<vmem>>, %arg5: memref<1x128xf32, #tpu.memory_space<vmem>>, %arg6: memref<128x128xf32, #tpu.memory_space<vmem>>, %arg7: memref<1x128xf32, #tpu.memory_space<vmem>>, %arg8: memref<8x10xf32, #tpu.memory_space<vmem>>) attributes {dimension_semantics = [#tpu.dimension_semantics<parallel>], iteration_bounds = array<i64: 1>, scalar_prefetch = 0 : i64, scratch_operands = 0 : i64, tpu.core_type = #tpu.core_type<tc>, window_params = [{transform_indices = @transform_0, window_bounds = array<i64: 8, 32>}, {pipeline_mode = #tpu.pipeline_mode<synchronous>, transform_indices = @transform_1, window_bounds = array<i64: 32, 128>}, {pipeline_mode = #tpu.pipeline_mode<synchronous>, transform_indices = @transform_2, window_bounds = array<i64: 1, 128>}, {pipeline_mode = #tpu.pipeline_mode<synchronous>, transform_indices = @transform_3, window_bounds = array<i64: 128, 128>}, {pipeline_mode = #tpu.pipeline_mode<synchronous>, transform_indices = @transform_4, window_bounds = array<i64: 1, 128>}, {pipeline_mode = #tpu.pipeline_mode<synchronous>, transform_indices = @transform_5, window_bounds = array<i64: 128, 128>}, {pipeline_mode = #tpu.pipeline_mode<synchronous>, transform_indices = @transform_6, window_bounds = array<i64: 1, 128>}, {transform_indices = @transform_7, window_bounds = array<i64: 8, 10>}]} {
    %c0 = arith.constant 0 : index
    %c0_0 = arith.constant 0 : index
    %0 = vector.load %arg1[%c0, %c0_0] : memref<8x32xf32, #tpu.memory_space<vmem>>, vector<8x32xf32>
    %c0_1 = arith.constant 0 : index
    %c0_2 = arith.constant 0 : index
    %1 = vector.load %arg2[%c0_1, %c0_2] : memref<32x128xf32, #tpu.memory_space<vmem>>, vector<32x128xf32>
    %cst = arith.constant dense<0.000000e+00> : vector<8x128xf32>
    %2 = tpu.matmul %0, %1, %cst {dimension_numbers = #tpu.dot_dimension_numbers<[1], [0], [0], [1], [0, 0, 1, 1], [], []>} : vector<8x32xf32>, vector<32x128xf32>, vector<8x128xf32> -> vector<8x128xf32>
    %c0_3 = arith.constant 0 : index
    %c0_4 = arith.constant 0 : index
    %3 = vector.load %arg3[%c0_3, %c0_4] : memref<1x128xf32, #tpu.memory_space<vmem>>, vector<1x128xf32>
    %4 = vector.broadcast %3 : vector<1x128xf32> to vector<8x128xf32>
    %5 = arith.addf %2, %4 : vector<8x128xf32>
    %6 = math.tanh %5 : vector<8x128xf32>
    %c0_5 = arith.constant 0 : index
    %c0_6 = arith.constant 0 : index
    %7 = vector.load %arg4[%c0_5, %c0_6] : memref<128x128xf32, #tpu.memory_space<vmem>>, vector<128x128xf32>
    %cst_7 = arith.constant dense<0.000000e+00> : vector<8x128xf32>
    %8 = tpu.matmul %6, %7, %cst_7 {dimension_numbers = #tpu.dot_dimension_numbers<[1], [0], [0], [1], [0, 0, 1, 1], [], []>} : vector<8x128xf32>, vector<128x128xf32>, vector<8x128xf32> -> vector<8x128xf32>
    %c0_8 = arith.constant 0 : index
    %c0_9 = arith.constant 0 : index
    %9 = vector.load %arg5[%c0_8, %c0_9] : memref<1x128xf32, #tpu.memory_space<vmem>>, vector<1x128xf32>
    %10 = vector.broadcast %9 : vector<1x128xf32> to vector<8x128xf32>
    %11 = arith.addf %8, %10 : vector<8x128xf32>
    %12 = math.tanh %11 : vector<8x128xf32>
    %c0_10 = arith.constant 0 : index
    %c0_11 = arith.constant 0 : index
    %13 = vector.load %arg6[%c0_10, %c0_11] : memref<128x128xf32, #tpu.memory_space<vmem>>, vector<128x128xf32>
    %cst_12 = arith.constant dense<0.000000e+00> : vector<8x128xf32>
    %14 = tpu.matmul %12, %13, %cst_12 {dimension_numbers = #tpu.dot_dimension_numbers<[1], [0], [0], [1], [0, 0, 1, 1], [], []>} : vector<8x128xf32>, vector<128x128xf32>, vector<8x128xf32> -> vector<8x128xf32>
    %c0_13 = arith.constant 0 : index
    %c0_14 = arith.constant 0 : index
    %15 = vector.load %arg7[%c0_13, %c0_14] : memref<1x128xf32, #tpu.memory_space<vmem>>, vector<1x128xf32>
    %16 = vector.broadcast %15 : vector<1x128xf32> to vector<8x128xf32>
    %17 = arith.addf %14, %16 : vector<8x128xf32>
    %18 = vector.extract_strided_slice %17 {offsets = [0, 0], sizes = [8, 10], strides = [1, 1]} : vector<8x128xf32> to vector<8x10xf32>
    %c0_15 = arith.constant 0 : index
    %c0_16 = arith.constant 0 : index
    %19 = vector.load %arg8[%c0_15, %c0_16] : memref<8x10xf32, #tpu.memory_space<vmem>>, vector<8x10xf32>
    tpu.vector_store %arg8[%c0_15, %c0_16], %18 {strides = array<i32>} : memref<8x10xf32, #tpu.memory_space<vmem>>, vector<8x10xf32>,
    return
  }
  func.func @transform_0(%arg0: i32) -> (i32, i32) {
    %c0_i32 = arith.constant 0 : i32
    %c0_i32_0 = arith.constant 0 : i32
    return %arg0, %c0_i32 : i32, i32
  }
  func.func @transform_1(%arg0: i32) -> (i32, i32) {
    %c0_i32 = arith.constant 0 : i32
    %c0_i32_0 = arith.constant 0 : i32
    %c0_i32_1 = arith.constant 0 : i32
    return %c0_i32, %c0_i32_0 : i32, i32
  }
  func.func @transform_2(%arg0: i32) -> (i32, i32) {
    %c0_i32 = arith.constant 0 : i32
    %c0_i32_0 = arith.constant 0 : i32
    %c0_i32_1 = arith.constant 0 : i32
    return %c0_i32, %c0_i32_0 : i32, i32
  }
  func.func @transform_3(%arg0: i32) -> (i32, i32) {
    %c0_i32 = arith.constant 0 : i32
    %c0_i32_0 = arith.constant 0 : i32
    %c0_i32_1 = arith.constant 0 : i32
    return %c0_i32, %c0_i32_0 : i32, i32
  }
  func.func @transform_4(%arg0: i32) -> (i32, i32) {
    %c0_i32 = arith.constant 0 : i32
    %c0_i32_0 = arith.constant 0 : i32
    %c0_i32_1 = arith.constant 0 : i32
    return %c0_i32, %c0_i32_0 : i32, i32
  }
  func.func @transform_5(%arg0: i32) -> (i32, i32) {
    %c0_i32 = arith.constant 0 : i32
    %c0_i32_0 = arith.constant 0 : i32
    %c0_i32_1 = arith.constant 0 : i32
    return %c0_i32, %c0_i32_0 : i32, i32
  }
  func.func @transform_6(%arg0: i32) -> (i32, i32) {
    %c0_i32 = arith.constant 0 : i32
    %c0_i32_0 = arith.constant 0 : i32
    %c0_i32_1 = arith.constant 0 : i32
    return %c0_i32, %c0_i32_0 : i32, i32
  }
  func.func @transform_7(%arg0: i32) -> (i32, i32) {
    %c0_i32 = arith.constant 0 : i32
    %c0_i32_0 = arith.constant 0 : i32
    return %arg0, %c0_i32 : i32, i32
  }
}

</mosaic_0001>

<bundles_post_ra>
// kernel: tpu_custom_call.1
= control target key start
LH: loop header
LB: loop body
LE: loop exit
PB: predicated region body
PF: predicated region fallthrough
CT: control target
= control target key end

     0   :  { %12 = vsyncpa [#allocation3], 0  ;;  %s438_s0 = inlined_call_operand.hbm [shape: f32[8,32], index: 0, kind: input, shape index: {}]   ;;  %s439_s1 = inlined_call_operand.hbm [shape: f32[32,128], index: 1, kind: input, shape index: {}]   ;;  %s440_s2 = inlined_call_operand.vmem [shape: f32[1,128], index: 2, kind: input, shape index: {}]   ;;  %s441_s3 = inlined_call_operand.hbm [shape: f32[128,128], index: 3, kind: input, shape index: {}]   ;;  %s442_s4 = inlined_call_operand.vmem [shape: f32[1,128], index: 4, kind: input, shape index: {}]   ;;  %s443_s5 = inlined_call_operand.hbm [shape: f32[128,128], index: 5, kind: input, shape index: {}]   ;;  %s444_s6 = inlined_call_operand.vmem [shape: f32[1,128], index: 6, kind: input, shape index: {}]   ;;  %s445_s7 = inlined_call_operand.hbm [shape: f32[8,10], index: 7, kind: output, shape index: {}]  }
   0x1   :  { %13 = vsyncpa [#allocation6], 0 }
   0x2   :  { %14 = vsyncpa [#allocation9], 0  ;;  %s31_s26 = sshll.u32 %s439_s1, 4  ;;  %s32_s26 = int_to_ptr.hbm [resolvable:$true] %s31_s26 }
   0x3   :  { %15 = vsyncpa [#allocation4], 0  ;;  %s367_s27 = smov [#allocation5]   ;;  %s21_s8 = sshll.u32 %s438_s0, 4  ;;  %s22_s8 = int_to_ptr.hbm [resolvable:$true] %s21_s8 }
   0x4   :  { %s33_s28 = sshll.u32 %s367_s27, 4  ;;  %s368_s9 = smov 128   ;;  %s34_s28 = int_to_ptr.vmem [resolvable:$true] %s33_s28 }
   0x5   :  { %s369_s10 = smov 8   ;;  %s370_s11 = smov [#allocation2]  }
   0x6   :  { %39 = dma.hbm_to_vmem [thread:$0]  %s32_s26, 512, %s34_s28, [#allocation6], %s368_s9, %s368_s9, %s369_s10  }
   0x7   :  { %s23_s12 = sshll.u32 %s370_s11, 4  ;;  %s46_s15 = sshll.u32 %s441_s3, 4  ;;  %s24_s12 = int_to_ptr.vmem [resolvable:$true] %s23_s12  ;;  %s47_s15 = int_to_ptr.hbm [resolvable:$true] %s46_s15 }
   0x8   :  { %26 = dma.hbm_to_vmem [thread:$0]  %s22_s8, 128, %s24_s12, [#allocation3]  }
   0x9   :  { %s61_s17 = sshll.u32 %s443_s5, 4  ;;  %s371_s18 = smov [#allocation7]   ;;  %s62_s17 = int_to_ptr.hbm [resolvable:$true] %s61_s17 }
   0xa   :  { %s48_s19 = sshll.u32 %s371_s18, 4  ;;  %s372_s0 = smov [#allocation8]   ;;  %s49_s19 = int_to_ptr.vmem [resolvable:$true] %s48_s19 }
   0xb   :  { %54 = dma.hbm_to_vmem [thread:$0]  %s47_s15, 2048, %s49_s19, [#allocation6], %s368_s9, %s368_s9, %s369_s10  }
   0xc   :  { %s63_s20 = sshll.u32 %s372_s0, 4  ;;  %s64_s20 = int_to_ptr.vmem [resolvable:$true] %s63_s20 }
   0xd   :  { %69 = dma.hbm_to_vmem [thread:$0]  %s62_s17, 2048, %s64_s20, [#allocation9], %s368_s9, %s368_s9, %s369_s10  }
   0xe   :  { %359 = dma.done.wait [#allocation3], 128  }
   0xf   :  { %360 = vsyncadd [#allocation3], 4294967168 }
  0x10   :  { %361 = dma.done.wait [#allocation6], 2560  }
  0x11   :  { %362 = vsyncadd [#allocation6], 4294964736 }
  0x12   :  { %363 = dma.done.wait [#allocation9], 2048  }
  0x13   :  { %364 = vsyncadd [#allocation9], 4294965248  ;;  %v92_v0 = vld [vmem:[#allocation5 + $0x18] sm:$0xff]  ;;  %v91_v1 = vld [vmem:[#allocation5 + $0x10] sm:$0xff]  ;;  %vm97_vm0 = vcmask 261120   ;;  %s373_s24 = smov [#allocation10]  }
  0x14   :  { %113 = vmatpush.msra.mxu0 %v92_v0  ;;  %v137_v2 = vld [vmem:[#allocation7 + $0x78] sm:$0xff]  ;;  %v90_v3 = vld [vmem:[#allocation5 + $0x8] sm:$0xff]  ;;  %v136_v4 = vld [vmem:[#allocation7 + $0x70] sm:$0xff]  ;;  %s210_s25 = sshll.u32 %s373_s24, 4  ;;  %s212_s28 = sshll.u32 %s445_s7, 4  ;;  %vm203_vm1 = vcmask 80896   ;;  %s211_s25 = int_to_ptr.vmem [resolvable:$true] %s210_s25  ;;  %s213_s28 = int_to_ptr.hbm [resolvable:$true] %s212_s28 }
  0x15   :  { %142 = vmatpush.msra.mxu1 %v137_v2  ;;  %v135_v5 = vld [vmem:[#allocation7 + $0x68] sm:$0xff]  ;;  %v89_v6 = vld [vmem:[#allocation5] sm:$0xff]  ;;  %v88_v7 = vld [vmem:[#allocation2] sm:$0xff] }
  0x16   :  { %114 = vmatpush.msra.mxu0 %v91_v1  ;;  %v134_v8 = vld [vmem:[#allocation7 + $0x60] sm:$0xff]  ;;  %v133_v9 = vld [vmem:[#allocation7 + $0x58] sm:$0xff]  ;;  %v132_v10 = vld [vmem:[#allocation7 + $0x50] sm:$0xff] }
  0x17   :  { %143 = vmatpush.msra.mxu1 %v136_v4  ;;  %v131_v11 = vld [vmem:[#allocation7 + $0x48] sm:$0xff]  ;;  %v130_v12 = vld [vmem:[#allocation7 + $0x40] sm:$0xff]  ;;  %v129_v13 = vld [vmem:[#allocation7 + $0x38] sm:$0xff] }
  0x18   :  { %115 = vmatpush.msra.mxu0 %v90_v3  ;;  %v128_v14 = vld [vmem:[#allocation7 + $0x30] sm:$0xff]  ;;  %v127_v15 = vld [vmem:[#allocation7 + $0x28] sm:$0xff]  ;;  %v126_v16 = vld [vmem:[#allocation7 + $0x20] sm:$0xff] }
  0x19   :  { %144 = vmatpush.msra.mxu1 %v135_v5  ;;  %v125_v17 = vld [vmem:[#allocation7 + $0x18] sm:$0xff]  ;;  %v124_v18 = vld [vmem:[#allocation7 + $0x10] sm:$0xff]  ;;  %v123_v19 = vld [vmem:[#allocation7 + $0x8] sm:$0xff] }
  0x1a   :  { %116 = vmatpush.msra.mxu0 %v89_v6  ;;  %v122_v20 = vld [vmem:[#allocation7] sm:$0xff]  ;;  %v178_v21 = vld [vmem:[#allocation8 + $0x78] sm:$0xff]  ;;  %v177_v22 = vld [vmem:[#allocation8 + $0x70] sm:$0xff] }
  0x1b   :  { %224 = vmatmul.msk.f32.vlgmr.msra.gmra.mxu0 %vm97_vm0, %v88_v7  ;;  %145 = vmatpush.msra.mxu1 %v134_v8  ;;  %v176_v23 = vld [vmem:[#allocation8 + $0x68] sm:$0xff]  ;;  %v175_v24 = vld [vmem:[#allocation8 + $0x60] sm:$0xff]  ;;  %v174_v25 = vld [vmem:[#allocation8 + $0x58] sm:$0xff] }
  0x1c   :  { %183 = vmatpush.msra.mxu2 %v178_v21  ;;  %v173_v26 = vld [vmem:[#allocation8 + $0x50] sm:$0xff]  ;;  %v172_v27 = vld [vmem:[#allocation8 + $0x48] sm:$0xff]  ;;  %v171_v28 = vld [vmem:[#allocation8 + $0x40] sm:$0xff] }
  0x1d   :  { %146 = vmatpush.msra.mxu1 %v133_v9  ;;  %v170_v29 = vld [vmem:[#allocation8 + $0x38] sm:$0xff]  ;;  %v169_v30 = vld [vmem:[#allocation8 + $0x30] sm:$0xff]  ;;  %v168_v31 = vld [vmem:[#allocation8 + $0x28] sm:$0xff] }
  0x1e   :  { %184 = vmatpush.msra.mxu2 %v177_v22  ;;  %v232_v32 = vld [vmem:[%s440_s2] ss:$0 sm:$0xff]  ;;  %v167_v36 = vld [vmem:[#allocation8 + $0x20] sm:$0xff]  ;;  %v165_v38 = vld [vmem:[#allocation8 + $0x10] sm:$0xff] }
  0x1f   :  { %147 = vmatpush.msra.mxu1 %v132_v10  ;;  %v166_v37 = vld [vmem:[#allocation8 + $0x18] sm:$0xff]  ;;  %v164_v39 = vld [vmem:[#allocation8 + $0x8] sm:$0xff]  ;;  %v163_v40 = vld [vmem:[#allocation8] sm:$0xff] }
  0x20   :  { %185 = vmatpush.msra.mxu2 %v176_v23  ;;  %v233_v41 = vld [vmem:[%s442_s4] ss:$0 sm:$0xff] }
  0x21   :  { %148 = vmatpush.msra.mxu1 %v131_v11  ;;  %v234_v45 = vld [vmem:[%s444_s6] ss:$0 sm:$0xff] }
  0x22   :  { %186 = vmatpush.msra.mxu2 %v175_v24 }
  0x23   :  { %149 = vmatpush.msra.mxu1 %v130_v12 }
  0x24   :  { %187 = vmatpush.msra.mxu2 %v174_v25 }
  0x25   :  { %150 = vmatpush.msra.mxu1 %v129_v13 }
  0x26   :  { %188 = vmatpush.msra.mxu2 %v173_v26 }
  0x27   :  { %151 = vmatpush.msra.mxu1 %v128_v14 }
  0x28   :  { %189 = vmatpush.msra.mxu2 %v172_v27 }
  0x29   :  { %152 = vmatpush.msra.mxu1 %v127_v15 }
  0x2a   :  { %190 = vmatpush.msra.mxu2 %v171_v28 }
  0x2b   :  { %153 = vmatpush.msra.mxu1 %v126_v16 }
  0x2c   :  { %191 = vmatpush.msra.mxu2 %v170_v29 }
  0x2d   :  { %154 = vmatpush.msra.mxu1 %v125_v17 }
  0x2e   :  { %192 = vmatpush.msra.mxu2 %v169_v30 }
  0x2f   :  { %155 = vmatpush.msra.mxu1 %v124_v18 }
  0x30   :  { %193 = vmatpush.msra.mxu2 %v168_v31 }
  0x31   :  { %156 = vmatpush.msra.mxu1 %v123_v19 }
  0x32   :  { %194 = vmatpush.msra.mxu2 %v167_v36 }
  0x33   :  { %157 = vmatpush.msra.mxu1 %v122_v20 }
  0x34   :  { %195 = vmatpush.msra.mxu2 %v166_v37 }
  0x36   :  { %196 = vmatpush.msra.mxu2 %v165_v38 }
  0x38   :  { %197 = vmatpush.msra.mxu2 %v164_v39 }
  0x3a   :  { %198 = vmatpush.msra.mxu2 %v163_v40 }
  0x98   :  { %v118_v33 = vpop.f32.mrf.mxu0 }
  0x99   :  { %v119_v34 = vadd.f32 %v232_v32, %v118_v33 }
  0x9b   :  { %235 = vtanh.f32 %v119_v34 }
  0xa1   :  { %v236_v35 = vpop.eup %235 }
  0xa2   :  { %158 = vmatmul.f32.vlgmr.msra.gmra.mxu1 %v236_v35 }
 0x11f   :  { %v159_v42 = vpop.f32.mrf.mxu1 }
 0x120   :  { %v160_v43 = vadd.f32 %v233_v41, %v159_v42 }
 0x122   :  { %237 = vtanh.f32 %v160_v43 }
 0x128   :  { %v238_v44 = vpop.eup %237 }
 0x129   :  { %199 = vmatmul.f32.vlgmr.msra.gmra.mxu2 %v238_v44 }
 0x1ac   :  { %v200_v46 = vpop.f32.mrf.mxu2 }
 0x1ad   :  { %v201_v47 = vadd.f32 %v234_v45, %v200_v46 }
 0x1af   :  { %204 = vst.msk [vmem:[#allocation10] sm:$0xff] %vm203_vm1, %v201_v47 }
 0x1b0   :  { %215 = dma.vmem_to_hbm [thread:$0]  %s211_s25, 128, %s213_s28, [#allocation4]  }
 0x1b1   :  { %365 = dma.done.wait [#allocation4], 128  }
 0x1b2   :  { %366 = vsyncadd [#allocation4], 4294967168 }
 0x1b3   :  { %220 = vsyncpa [#allocation3], 1 }
 0x1b4   :  { %221 = vsyncpa [#allocation6], 1 }
 0x1b5   :  { %222 = vsyncpa [#allocation9], 1 }
 0x1b6   :  { %223 = vsyncpa [#allocation4], 1 }

</bundles_post_ra>
